<compile_context>
chip_gen: v6e
topology: v6e:2x2x1
jax: 0.10.0
libtpu: 0.0.40
codegen_flags: <defaults>
</compile_context>

<pallas_src>
import functools

import jax
import jax.numpy as jnp
from jax import lax
from jax.experimental import pallas as pl
from jax.experimental.pallas import tpu as pltpu

BN_EPS = 1e-5


# ------------------------------ Pallas kernel --------------------------------

def _sepconv_kernel(x_ref, *refs, repeats, taps, compute_dtype):
    """Chained SepConv repeats, entirely in VMEM.

    x_ref: (H0, W0*C0)  one image, channels minormost in the lane axis.
    For each repeat r, three weight refs follow:
      S_ref:     (taps*Ho_r, H_r)          0/1 row-shift/stride/zero-pad matrices (stacked over ky)
      M_ref:     (taps*W_r*C_r, Wo_r*Co)   banded depthwise(kx) + pointwise + BN-scale matrices
      shift_ref: (1, Wo_r*Co)              BN shift tiled over output columns
    The last ref is the output tile (Ho_last, Wo_last*Co).
    """
    o_ref = refs[-1]
    w_refs = refs[:-1]
    cur = x_ref[...].astype(jnp.float32)
    for r in range(repeats):
        s_ref = w_refs[3 * r]
        m_ref = w_refs[3 * r + 1]
        sh_ref = w_refs[3 * r + 2]
        ho = s_ref.shape[0] // taps
        lin = m_ref.shape[0] // taps
        lout = m_ref.shape[1]

        x_c = cur.astype(compute_dtype)
        acc = jnp.zeros((ho, lout), jnp.float32)
        for ky in range(taps):
            s_mat = s_ref[ky * ho:(ky + 1) * ho, :]        # (Ho, H_r), 0/1 -> aligned slice
            m_mat = m_ref[ky * lin:(ky + 1) * lin, :]      # (W_r*C_r, Wo_r*Co)
            # Row tap / stride / zero-pad: exact (one 0/1 term per output row).
            xs = jnp.dot(s_mat, x_c, preferred_element_type=compute_dtype)
            # Folded depthwise(kx taps) * pointwise * BN-scale, f32 accumulation on the MXU.
            acc = acc + jnp.dot(xs, m_mat, preferred_element_type=jnp.float32)
        # BN shift + ReLU epilogue in-register; result feeds the next repeat (or the store).
        cur = jnp.maximum(acc + sh_ref[...], 0.0)
    o_ref[...] = cur.astype(o_ref.dtype)


# --------------------------- host-side weight folding -------------------------

def _unit_weights(p, h_in, w_in, *, k, stride, padding, dilation, compute_dtype):
    """Fold one depthwise+pointwise+BN unit into (S, M, shift) for the kernel."""
    w_dw, w_pw = p["w_dw"], p["w_pw"]
    c_in = w_dw.shape[0]
    c_out = w_pw.shape[0]
    span = dilation * (k - 1)
    h_out = (h_in + 2 * padding - span - 1) // stride + 1
    w_out = (w_in + 2 * padding - span - 1) // stride + 1
    assert h_out > 0 and w_out > 0

    scale = p["gamma"] / jnp.sqrt(p["var"] + BN_EPS)           # (Co,)
    wpw_s = w_pw[:, :, 0, 0] * scale[:, None]                  # (Co, Ci), BN scale folded
    shift = p["beta"] - p["mean"] * scale                      # (Co,)

    # S_ky[ro, i] = 1 iff i == stride*ro + ky*dilation - padding (in range); out-of-range
    # indices are simply absent -> implicit zero padding of the rows.
    ky = jnp.arange(k)[:, None, None]
    ro = jnp.arange(h_out)[None, :, None]
    ii = jnp.arange(h_in)[None, None, :]
    s_mat = (ii == stride * ro + ky * dilation - padding).astype(compute_dtype)
    s_mat = s_mat.reshape(k * h_out, h_in)

    # M_ky[b*Ci + c, w*Co + f] = sum_{kx : b == stride*w + kx*dilation - padding}
    #                               w_dw[c, ky, kx] * w_pw[f, c] * bn_scale[f]
    kx = jnp.arange(k)[:, None, None]
    bb = jnp.arange(w_in)[None, :, None]
    ww = jnp.arange(w_out)[None, None, :]
    t_col = (bb == stride * ww + kx * dilation - padding).astype(jnp.float32)  # (k, Win, Wo)
    d = jnp.einsum("cyx,fc->yxcf", w_dw[:, 0], wpw_s)                          # (k, k, Ci, Co)
    m_mat = jnp.einsum("xbw,yxcf->ybcwf", t_col, d)                            # (k, Win, Ci, Wo, Co)
    m_mat = m_mat.reshape(k * w_in * c_in, w_out * c_out).astype(compute_dtype)

    shift_lane = jnp.tile(shift, w_out).reshape(1, w_out * c_out).astype(jnp.float32)
    return (s_mat, m_mat, shift_lane), (h_out, w_out, c_out)


# --------------------------------- wrapper ------------------------------------

def sep_conv_forward(x_nchw, params, *, kernel_size, stride, padding, dilation=1,
                     compute_dtype=jnp.float32):
    """Pallas forward of SepConv: len(params) repeats of dw-conv + 1x1 conv + BN + ReLU."""
    n, c_in, h, w = x_nchw.shape
    k = kernel_size
    assert params[0]["w_dw"].shape[0] == c_in
    # NCHW -> (N, H, W*C) once; channels minormost in the packed lane axis.
    x_packed = jnp.transpose(x_nchw, (0, 2, 3, 1)).reshape(n, h, w * c_in)

    weight_args = []
    in_specs = [pl.BlockSpec((None, h, w * c_in), lambda i: (i, 0, 0))]
    h_r, w_r, c_r = h, w, c_in
    flops = 0
    for p in params:
        assert p["w_dw"].shape[0] == c_r, "repeat input channels must match previous output"
        (s_mat, m_mat, shift_lane), (h_o, w_o, c_o) = _unit_weights(
            p, h_r, w_r, k=k, stride=stride, padding=padding, dilation=dilation,
            compute_dtype=compute_dtype)
        for arr in (s_mat, m_mat, shift_lane):
            weight_args.append(arr)
            in_specs.append(pl.BlockSpec(arr.shape, lambda i: (0, 0)))
        flops += 2 * n * k * (h_o * h_r * (w_r * c_r) + h_o * (w_r * c_r) * (w_o * c_o))
        h_r, w_r, c_r = h_o, w_o, c_o

    bytes_accessed = int(
        x_packed.size * x_packed.dtype.itemsize
        + sum(a.size * a.dtype.itemsize for a in weight_args)
        + n * h_r * w_r * c_r * 4)

    kernel = functools.partial(_sepconv_kernel, repeats=len(params), taps=k,
                               compute_dtype=compute_dtype)
    out = pl.pallas_call(
        kernel,
        out_shape=jax.ShapeDtypeStruct((n, h_r, w_r * c_r), jnp.float32),
        grid_spec=pltpu.PrefetchScalarGridSpec(
            num_scalar_prefetch=0,
            grid=(n,),
            in_specs=in_specs,
            out_specs=pl.BlockSpec((None, h_r, w_r * c_r), lambda i: (i, 0, 0)),
        ),
        compiler_params=pltpu.CompilerParams(dimension_semantics=("parallel",)),
        cost_estimate=pl.CostEstimate(flops=int(flops), transcendentals=0,
                                      bytes_accessed=bytes_accessed),
    )(x_packed, *weight_args)

    out = out.reshape(n, h_r, w_r, c_r)
    return jnp.transpose(out, (0, 3, 1, 2))                   # NHWC -> NCHW (once)


# --------------------------- pure-JAX reference -------------------------------

def sep_conv_reference(x_nchw, params, *, kernel_size, stride, padding, dilation=1):
    y = x_nchw
    for p in params:
        c_in = p["w_dw"].shape[0]
        dw = lax.conv_general_dilated(
            y, p["w_dw"], (stride, stride), [(padding, padding)] * 2,
            rhs_dilation=(dilation, dilation),
            dimension_numbers=("NCHW", "OIHW", "NCHW"),
            feature_group_count=c_in)
        pw = lax.conv_general_dilated(
            dw, p["w_pw"], (1, 1), [(0, 0), (0, 0)],
            dimension_numbers=("NCHW", "OIHW", "NCHW"))
        inv = p["gamma"] / jnp.sqrt(p["var"] + BN_EPS)
        scale = inv.reshape(1, -1, 1, 1)
        shift = (p["beta"] - p["mean"] * inv).reshape(1, -1, 1, 1)
        y = jnp.maximum(pw * scale + shift, 0.0)
    return y


# --------------------------------- params ------------------------------------

def make_sep_params(key, c_in, c_out, k, affine=True):
    """Deterministic params for one repeat: depthwise conv, pointwise conv, BN stats."""
    k1, k2, k3, k4, k5, k6 = jax.random.split(key, 6)
    w_dw = jax.random.normal(k1, (c_in, 1, k, k), jnp.float32) / k
    w_pw = jax.random.normal(k2, (c_out, c_in, 1, 1), jnp.float32) / jnp.sqrt(float(c_in))
    if affine:
        gamma = 1.0 + 0.1 * jax.random.normal(k3, (c_out,), jnp.float32)
        beta = 0.1 * jax.random.normal(k4, (c_out,), jnp.float32)
    else:
        gamma = jnp.ones((c_out,), jnp.float32)
        beta = jnp.zeros((c_out,), jnp.float32)
    mean = 0.1 * jax.random.normal(k5, (c_out,), jnp.float32)
    var = 1.0 + 0.1 * jax.random.uniform(k6, (c_out,), jnp.float32)
    return dict(w_dw=w_dw, w_pw=w_pw, gamma=gamma, beta=beta, mean=mean, var=var)


# ----------------------------------- main -------------------------------------

if __name__ == "__main__":
    key = jax.random.PRNGKey(0)
    kx1, kx2, kp1, kp2 = jax.random.split(key, 4)

    fwd = jax.jit(sep_conv_forward,
                  static_argnames=("kernel_size", "stride", "padding",
                                   "dilation", "compute_dtype"))

    # Tolerances: MXU matmuls round operands to bf16-class passes at default precision,
    # so allow a few e-3 absolute error vs the f32 XLA-conv reference (structural bugs
    # would show up as O(1) errors).
    TOL_F32 = 2e-2
    TOL_BF16 = 1e-1

    # Config 1: SepConv(C_in=4, C_out=8, kernel_size=3, stride=1, padding=1), repeats=1.
    N, C_in, C_out, H, W = 2, 4, 8, 16, 16
    x = jax.random.normal(kx1, (N, C_in, H, W), jnp.float32)
    params1 = [make_sep_params(kp1, C_in, C_out, 3)]
    out1 = fwd(x, params1, kernel_size=3, stride=1, padding=1)
    jax.block_until_ready(out1)
    ref1 = sep_conv_reference(x, params1, kernel_size=3, stride=1, padding=1)
    assert out1.shape == (N, C_out, H, W), out1.shape
    err1 = float(jnp.max(jnp.abs(out1 - ref1)))
    assert err1 < TOL_F32, err1

    # Config 2: repeats=2 (C_in == C_out), both repeats fused into ONE pallas_call.
    C2 = 8
    x2 = jax.random.normal(kx2, (N, C2, H, W), jnp.float32)
    params2 = [make_sep_params(kk, C2, C2, 3) for kk in jax.random.split(kp2, 2)]
    out2 = fwd(x2, params2, kernel_size=3, stride=1, padding=1)
    jax.block_until_ready(out2)
    ref2 = sep_conv_reference(x2, params2, kernel_size=3, stride=1, padding=1)
    assert out2.shape == (N, C2, H, W), out2.shape
    err2 = float(jnp.max(jnp.abs(out2 - ref2)))
    assert err2 < TOL_F32, err2

    # Config 3: stride=2 — strided output rows/cols are computed directly in-kernel
    # (folded into S/M), no dense-then-subsample waste.
    out3 = fwd(x, params1, kernel_size=3, stride=2, padding=1)
    jax.block_until_ready(out3)
    ref3 = sep_conv_reference(x, params1, kernel_size=3, stride=2, padding=1)
    assert out3.shape == (N, C_out, 8, 8), out3.shape
    err3 = float(jnp.max(jnp.abs(out3 - ref3)))
    assert err3 < TOL_F32, err3

    # Config 4: bf16 MXU operands (weights pre-cast host-side); looser tolerance vs f32 ref.
    out4 = fwd(x, params1, kernel_size=3, stride=1, padding=1,
               compute_dtype=jnp.bfloat16)
    jax.block_until_ready(out4)
    err4 = float(jnp.max(jnp.abs(out4 - ref1)))
    assert err4 < TOL_BF16, err4

    print("KERNEL_OK")
</pallas_src>

<mosaic_0001>
module attributes {stable_mosaic.version = 11 : i64} {
  func.func @_sepconv_kernel(%arg0: i32, %arg1: memref<1x16x64xf32, #tpu.memory_space<vmem>>, %arg2: memref<48x16xf32, #tpu.memory_space<vmem>>, %arg3: memref<192x128xf32, #tpu.memory_space<vmem>>, %arg4: memref<1x128xf32, #tpu.memory_space<vmem>>, %arg5: memref<1x16x128xf32, #tpu.memory_space<vmem>>) attributes {dimension_semantics = [#tpu.dimension_semantics<parallel>], iteration_bounds = array<i64: 2>, scalar_prefetch = 0 : i64, scratch_operands = 0 : i64, tpu.core_type = #tpu.core_type<tc>, window_params = [{transform_indices = @transform_0, window_bounds = array<i64: 1, 16, 64>}, {pipeline_mode = #tpu.pipeline_mode<synchronous>, transform_indices = @transform_1, window_bounds = array<i64: 48, 16>}, {pipeline_mode = #tpu.pipeline_mode<synchronous>, transform_indices = @transform_2, window_bounds = array<i64: 192, 128>}, {pipeline_mode = #tpu.pipeline_mode<synchronous>, transform_indices = @transform_3, window_bounds = array<i64: 1, 128>}, {transform_indices = @transform_4, window_bounds = array<i64: 1, 16, 128>}]} {
    %c0 = arith.constant 0 : index
    %c0_0 = arith.constant 0 : index
    %c0_1 = arith.constant 0 : index
    %0 = vector.load %arg1[%c0, %c0_0, %c0_1] : memref<1x16x64xf32, #tpu.memory_space<vmem>>, vector<1x16x64xf32>
    %1 = vector.shape_cast %0 : vector<1x16x64xf32> to vector<16x64xf32>
    %cst = arith.constant 0.000000e+00 : f32
    %2 = vector.broadcast %cst : f32 to vector<16x128xf32>
    %c0_2 = arith.constant 0 : index
    %c0_3 = arith.constant 0 : index
    %3 = vector.load %arg2[%c0_2, %c0_3] : memref<48x16xf32, #tpu.memory_space<vmem>>, vector<16x16xf32>
    %c0_4 = arith.constant 0 : index
    %c0_5 = arith.constant 0 : index
    %4 = vector.load %arg3[%c0_4, %c0_5] : memref<192x128xf32, #tpu.memory_space<vmem>>, vector<64x128xf32>
    %cst_6 = arith.constant dense<0.000000e+00> : vector<16x64xf32>
    %5 = tpu.matmul %3, %1, %cst_6 {dimension_numbers = #tpu.dot_dimension_numbers<[1], [0], [0], [1], [0, 0, 1, 1], [], []>} : vector<16x16xf32>, vector<16x64xf32>, vector<16x64xf32> -> vector<16x64xf32>
    %cst_7 = arith.constant dense<0.000000e+00> : vector<16x128xf32>
    %6 = tpu.matmul %5, %4, %cst_7 {dimension_numbers = #tpu.dot_dimension_numbers<[1], [0], [0], [1], [0, 0, 1, 1], [], []>} : vector<16x64xf32>, vector<64x128xf32>, vector<16x128xf32> -> vector<16x128xf32>
    %7 = arith.addf %2, %6 : vector<16x128xf32>
    %c16 = arith.constant 16 : index
    %c0_8 = arith.constant 0 : index
    %8 = vector.load %arg2[%c16, %c0_8] : memref<48x16xf32, #tpu.memory_space<vmem>>, vector<16x16xf32>
    %c64 = arith.constant 64 : index
    %c0_9 = arith.constant 0 : index
    %9 = vector.load %arg3[%c64, %c0_9] : memref<192x128xf32, #tpu.memory_space<vmem>>, vector<64x128xf32>
    %cst_10 = arith.constant dense<0.000000e+00> : vector<16x64xf32>
    %10 = tpu.matmul %8, %1, %cst_10 {dimension_numbers = #tpu.dot_dimension_numbers<[1], [0], [0], [1], [0, 0, 1, 1], [], []>} : vector<16x16xf32>, vector<16x64xf32>, vector<16x64xf32> -> vector<16x64xf32>
    %cst_11 = arith.constant dense<0.000000e+00> : vector<16x128xf32>
    %11 = tpu.matmul %10, %9, %cst_11 {dimension_numbers = #tpu.dot_dimension_numbers<[1], [0], [0], [1], [0, 0, 1, 1], [], []>} : vector<16x64xf32>, vector<64x128xf32>, vector<16x128xf32> -> vector<16x128xf32>
    %12 = arith.addf %7, %11 : vector<16x128xf32>
    %c32 = arith.constant 32 : index
    %c0_12 = arith.constant 0 : index
    %13 = vector.load %arg2[%c32, %c0_12] : memref<48x16xf32, #tpu.memory_space<vmem>>, vector<16x16xf32>
    %c128 = arith.constant 128 : index
    %c0_13 = arith.constant 0 : index
    %14 = vector.load %arg3[%c128, %c0_13] : memref<192x128xf32, #tpu.memory_space<vmem>>, vector<64x128xf32>
    %cst_14 = arith.constant dense<0.000000e+00> : vector<16x64xf32>
    %15 = tpu.matmul %13, %1, %cst_14 {dimension_numbers = #tpu.dot_dimension_numbers<[1], [0], [0], [1], [0, 0, 1, 1], [], []>} : vector<16x16xf32>, vector<16x64xf32>, vector<16x64xf32> -> vector<16x64xf32>
    %cst_15 = arith.constant dense<0.000000e+00> : vector<16x128xf32>
    %16 = tpu.matmul %15, %14, %cst_15 {dimension_numbers = #tpu.dot_dimension_numbers<[1], [0], [0], [1], [0, 0, 1, 1], [], []>} : vector<16x64xf32>, vector<64x128xf32>, vector<16x128xf32> -> vector<16x128xf32>
    %17 = arith.addf %12, %16 : vector<16x128xf32>
    %c0_16 = arith.constant 0 : index
    %c0_17 = arith.constant 0 : index
    %18 = vector.load %arg4[%c0_16, %c0_17] : memref<1x128xf32, #tpu.memory_space<vmem>>, vector<1x128xf32>
    %19 = vector.broadcast %18 : vector<1x128xf32> to vector<16x128xf32>
    %20 = arith.addf %17, %19 : vector<16x128xf32>
    %cst_18 = arith.constant 0.000000e+00 : f32
    %21 = vector.broadcast %cst_18 : f32 to vector<16x128xf32>
    %22 = arith.maximumf %20, %21 : vector<16x128xf32>
    %c0_19 = arith.constant 0 : index
    %c0_20 = arith.constant 0 : index
    %c0_21 = arith.constant 0 : index
    %23 = vector.load %arg5[%c0_19, %c0_20, %c0_21] : memref<1x16x128xf32, #tpu.memory_space<vmem>>, vector<1x16x128xf32>
    %24 = vector.shape_cast %23 : vector<1x16x128xf32> to vector<16x128xf32>
    %25 = vector.shape_cast %22 : vector<16x128xf32> to vector<1x16x128xf32>
    tpu.vector_store %arg5[%c0_19, %c0_20, %c0_21], %25 {strides = array<i32>} : memref<1x16x128xf32, #tpu.memory_space<vmem>>, vector<1x16x128xf32>,
    return
  }
  func.func @transform_0(%arg0: i32) -> (i32, i32, i32) {
    %c0_i32 = arith.constant 0 : i32
    %c0_i32_0 = arith.constant 0 : i32
    %c0_i32_1 = arith.constant 0 : i32
    return %arg0, %c0_i32, %c0_i32_0 : i32, i32, i32
  }
  func.func @transform_1(%arg0: i32) -> (i32, i32) {
    %c0_i32 = arith.constant 0 : i32
    %c0_i32_0 = arith.constant 0 : i32
    %c0_i32_1 = arith.constant 0 : i32
    return %c0_i32, %c0_i32_0 : i32, i32
  }
  func.func @transform_2(%arg0: i32) -> (i32, i32) {
    %c0_i32 = arith.constant 0 : i32
    %c0_i32_0 = arith.constant 0 : i32
    %c0_i32_1 = arith.constant 0 : i32
    return %c0_i32, %c0_i32_0 : i32, i32
  }
  func.func @transform_3(%arg0: i32) -> (i32, i32) {
    %c0_i32 = arith.constant 0 : i32
    %c0_i32_0 = arith.constant 0 : i32
    %c0_i32_1 = arith.constant 0 : i32
    return %c0_i32, %c0_i32_0 : i32, i32
  }
  func.func @transform_4(%arg0: i32) -> (i32, i32, i32) {
    %c0_i32 = arith.constant 0 : i32
    %c0_i32_0 = arith.constant 0 : i32
    %c0_i32_1 = arith.constant 0 : i32
    return %arg0, %c0_i32, %c0_i32_0 : i32, i32, i32
  }
}

</mosaic_0001>

<bundles_post_ra>
// kernel: tile.8
= control target key start
LH: loop header
LB: loop body
LE: loop exit
PB: predicated region body
PF: predicated region fallthrough
CT: control target
= control target key end

     0   :  { %s28_s0 = inlined_call_operand.vmem [shape: f32[8], index: 0, kind: input, shape index: {}]   ;;  %s29_s1 = inlined_call_operand.vmem [shape: f32[16,8], index: 1, kind: output, shape index: {}]  }
   0x1   :  { %v4_v0 = vld [vmem:[%s28_s0] ss:$0 sm:$0xff] }
   0x2   :  { %5 = vst [vmem:[%s29_s1] sm:$0xff] %v4_v0  ;;  %8 = vst [vmem:[%s29_s1 + $0x8] sm:$0xff] %v4_v0 }

// kernel: tile.9
= control target key start
LH: loop header
LB: loop body
LE: loop exit
PB: predicated region body
PF: predicated region fallthrough
CT: control target
= control target key end

     0   :  { %s133_s10 = smov 120   ;;  %s134_s11 = smov 104   ;;  %vm3_vm0 = vcmask 64512   ;;  %vm9_vm1 = vcmask 1048512   ;;  %vm15_vm2 = vcmask 982912   ;;  %vm21_vm3 = vcmask 917312   ;;  %s209_s0 = inlined_call_operand.vmem [shape: f32[16,8], index: 0, kind: input, shape index: {}]   ;;  %s210_s1 = inlined_call_operand.vmem [shape: f32[1,128], index: 1, kind: output, shape index: {}]  }
   0x1   :  { %v103_v0 = vld [vmem:[%s209_s0 + $0xf] sm:$0x1]   ;;  %v105_v1 = vld [vmem:[%s209_s0 + $0xd] sm:$0x1]   ;;  %v104_v2 = vld [vmem:[%s209_s0 + $0xe] sm:$0x1]  }
   0x2   :  { %7 = vrot.lane.b32.xlu0 %v103_v0, %s133_s10  ;;  %19 = vrot.lane.b32.xlu1 %v105_v1, %s134_s11  ;;  %v106_v3 = vld [vmem:[%s209_s0 + $0xc] sm:$0x1]   ;;  %s135_s16 = smov 112   ;;  %s136_s17 = smov 96   ;;  %v107_v4 = vld [vmem:[%s209_s0 + $0xb] sm:$0x1]  }
   0x3   :  { %v108_v5 = vld [vmem:[%s209_s0 + $0xa] sm:$0x1]   ;;  %v2_v6 = vld [vmem:[%s209_s0] sm:$0x1]   ;;  %s137_s24 = smov 88   ;;  %s138_s25 = smov 80  }
   0x4   :  { %4 = vst.msk [vmem:[#allocation0] sm:$0x1] %vm3_vm0, %v2_v6   ;;  %v109_v7 = vld [vmem:[%s209_s0 + $0x9] sm:$0x1]   ;;  %v110_v8 = vld [vmem:[%s209_s0 + $0x8] sm:$0x1]  }
   0x5   :  { %s139_s30 = smov 72   ;;  %s140_s2 = smov 64   ;;  %v111_v9 = vld [vmem:[%s209_s0 + $0x7] sm:$0x1]   ;;  %v112_v10 = vld [vmem:[%s209_s0 + $0x6] sm:$0x1]  }
   0x6   :  { %13 = vrot.lane.b32.xlu0 %v104_v2, %s135_s16  ;;  %25 = vrot.lane.b32.xlu1 %v106_v3, %s136_s17  ;;  %s141_s7 = smov 56   ;;  %s142_s8 = smov 48   ;;  %v113_v11 = vld [vmem:[%s209_s0 + $0x5] sm:$0x1]   ;;  %v114_v12 = vld [vmem:[%s209_s0 + $0x4] sm:$0x1]  }
   0x7   :  { %s143_s13 = smov 40   ;;  %s144_s14 = smov 32   ;;  %v115_v13 = vld [vmem:[%s209_s0 + $0x3] sm:$0x1]   ;;  %v116_v14 = vld [vmem:[%s209_s0 + $0x2] sm:$0x1]  }
   0x8   :  { %s145_s19 = smov 24   ;;  %s146_s20 = smov 16   ;;  %v117_v15 = vld [vmem:[%s209_s0 + $0x1] sm:$0x1]   ;;  %vm27_vm4 = vcmask 851712   ;;  %vm33_vm5 = vcmask 786112  }
   0x9   :  { %s147_s0 = smov 8   ;;  %vm39_vm6 = vcmask 720512   ;;  %vm45_vm7 = vcmask 654912   ;;  %vm51_vm8 = vcmask 589312   ;;  %vm57_vm9 = vcmask 523712  }
   0xa   :  { %31 = vrot.lane.b32.xlu0 %v107_v4, %s137_s24  ;;  %37 = vrot.lane.b32.xlu1 %v108_v5, %s138_s25  ;;  %vm63_vm10 = vcmask 458112   ;;  %vm69_vm11 = vcmask 392512   ;;  %vm75_vm12 = vcmask 326912   ;;  %vm81_vm13 = vcmask 261312  }
   0xb   :  { %vm87_vm14 = vcmask 195712   ;;  %vm93_vm15 = vcmask 130112  }
   0xe   :  { %43 = vrot.lane.b32.xlu0 %v109_v7, %s139_s30  ;;  %49 = vrot.lane.b32.xlu1 %v110_v8, %s140_s2 }
  0x12   :  { %55 = vrot.lane.b32.xlu0 %v111_v9, %s141_s7  ;;  %61 = vrot.lane.b32.xlu1 %v112_v10, %s142_s8 }
  0x16   :  { %67 = vrot.lane.b32.xlu0 %v113_v11, %s143_s13  ;;  %73 = vrot.lane.b32.xlu1 %v114_v12, %s144_s14 }
  0x1a   :  { %79 = vrot.lane.b32.xlu0 %v115_v13, %s145_s19  ;;  %85 = vrot.lane.b32.xlu1 %v116_v14, %s146_s20 }
  0x1e   :  { %91 = vrot.lane.b32.xlu0 %v117_v15, %s147_s0 }
  0x74   :  { %v8_v16 = vpop.permute.xlu0 %7   ;;  %v20_v17 = vpop.permute.xlu1 %19  }
  0x75   :  { %10 = vst.msk [vmem:[#allocation0] sm:$0x1] %vm9_vm1, %v8_v16  }
  0x78   :  { %v14_v18 = vpop.permute.xlu0 %13   ;;  %v26_v19 = vpop.permute.xlu1 %25  }
  0x79   :  { %16 = vst.msk [vmem:[#allocation0] sm:$0x1] %vm15_vm2, %v14_v18  }
  0x7a   :  { %22 = vst.msk [vmem:[#allocation0] sm:$0x1] %vm21_vm3, %v20_v17  }
  0x7b   :  { %28 = vst.msk [vmem:[#allocation0] sm:$0x1] %vm27_vm4, %v26_v19  }
  0x7c   :  { %v32_v20 = vpop.permute.xlu0 %31   ;;  %v38_v21 = vpop.permute.xlu1 %37  }
  0x7d   :  { %34 = vst.msk [vmem:[#allocation0] sm:$0x1] %vm33_vm5, %v32_v20  }
  0x7e   :  { %40 = vst.msk [vmem:[#allocation0] sm:$0x1] %vm39_vm6, %v38_v21  }
  0x80   :  { %v44_v22 = vpop.permute.xlu0 %43   ;;  %v50_v23 = vpop.permute.xlu1 %49  }
  0x81   :  { %46 = vst.msk [vmem:[#allocation0] sm:$0x1] %vm45_vm7, %v44_v22  }
  0x82   :  { %52 = vst.msk [vmem:[#allocation0] sm:$0x1] %vm51_vm8, %v50_v23  }
  0x84   :  { %v56_v24 = vpop.permute.xlu0 %55   ;;  %v62_v25 = vpop.permute.xlu1 %61  }
  0x85   :  { %58 = vst.msk [vmem:[#allocation0] sm:$0x1] %vm57_vm9, %v56_v24  }
  0x86   :  { %64 = vst.msk [vmem:[#allocation0] sm:$0x1] %vm63_vm10, %v62_v25  }
  0x88   :  { %v68_v26 = vpop.permute.xlu0 %67   ;;  %v74_v27 = vpop.permute.xlu1 %73  }
  0x89   :  { %70 = vst.msk [vmem:[#allocation0] sm:$0x1] %vm69_vm11, %v68_v26  }
  0x8a   :  { %76 = vst.msk [vmem:[#allocation0] sm:$0x1] %vm75_vm12, %v74_v27  }
  0x8c   :  { %v80_v28 = vpop.permute.xlu0 %79   ;;  %v86_v29 = vpop.permute.xlu1 %85  }
  0x8d   :  { %82 = vst.msk [vmem:[#allocation0] sm:$0x1] %vm81_vm13, %v80_v28  }
  0x8e   :  { %88 = vst.msk [vmem:[#allocation0] sm:$0x1] %vm87_vm14, %v86_v29  }
  0x90   :  { %v92_v30 = vpop.permute.xlu0 %91  }
  0x91   :  { %94 = vst.msk [vmem:[#allocation0] sm:$0x1] %vm93_vm15, %v92_v30  }
  0x98   :  { %v99_v31 = vld [vmem:[#allocation0] sm:$0x1] }
  0x99   :  { %102 = vst [vmem:[%s210_s1] sm:$0x1] %v99_v31 }

// kernel: sep_conv_forward.1
= control target key start
LH: loop header
LB: loop body
LE: loop exit
PB: predicated region body
PF: predicated region fallthrough
CT: control target
= control target key end

     0   :  { %s975_s15 = smov 0   ;;  %s1120_s0 = inlined_call_operand.vmem [shape: f32[2,16,64], index: 0, kind: input, shape index: {}]   ;;  %s1121_s1 = inlined_call_operand.vmem [shape: f32[48,16], index: 1, kind: input, shape index: {}]   ;;  %s1122_s2 = inlined_call_operand.vmem [shape: f32[192,128], index: 2, kind: input, shape index: {}]   ;;  %s1123_s3 = inlined_call_operand.vmem [shape: f32[1,128], index: 3, kind: input, shape index: {}]   ;;  %s1124_s4 = inlined_call_operand.vmem [shape: f32[2,16,128], index: 4, kind: output, shape index: {}]  }
   0x1 LB: > { %s788_s16 = sadd.s32 4294967295, %s948_s15   ;;  %p792_p0 = scmp.ge.s32.totalorder %s948_s15, 1  ;;  %s948_s15 = sphi %s975_s15, %s14_s15  }
   0x2   : > { %p162_p1 = scmp.lt.s32.totalorder %s948_s15, 3 }
   0x4   : > { %p163_p2 = pnand %p792_p0, %p162_p1 }
   0x5   : > { %p188_p3 = scmp.lt.s32.totalorder (!%p163_p2), %s788_s16, 1 }
   0x6   : > { %166 = sbr.rel (%p163_p2) target bundleno = 622 (0x26e), region = 36 }
   0xb   : > { %v200_v0 = vld [vmem:[%s1121_s1] sm:$0xff]  ;;  %vm210_vm0 = vcmask 130048   ;;  %v209_v1 = vld [vmem:[%s1122_s2 + $0x38] sm:$0xff]  ;;  %v208_v2 = vld [vmem:[%s1122_s2 + $0x30] sm:$0xff]  ;;  %s1126_s16 = smov (!%p188_p3, %s788_s16), 1  ;;  %vm383_vm1 = vcmask 523264  }
   0xc   : > { %860 = vmatprep.mubr.msk.f32.mxu0 %vm210_vm0, %v200_v0  ;;  %889 = vmatprep.subr.mxu1 %v209_v1  ;;  %v207_v3 = vld [vmem:[%s1122_s2 + $0x28] sm:$0xff]  ;;  %s812_s25 = sshll.u32 %s1126_s16, 4  ;;  %v206_v4 = vld [vmem:[%s1122_s2 + $0x20] sm:$0xff]  ;;  %v205_v7 = vld [vmem:[%s1122_s2 + $0x18] sm:$0xff] }
   0xd   : > { %890 = vmatpush3.msra.mxu1 %v209_v1  ;;  %s192_s28 = scalar_lea.vmem %s1120_s0, %s812_s25  ;;  %v201_v8 = vld [vmem:[%s1121_s1 + $0x8] sm:$0xff]  ;;  %v292_v9 = vld [vmem:[%s1121_s1 + $0x10] sm:$0xff]  ;;  %v293_v11 = vld [vmem:[%s1121_s1 + $0x18] sm:$0xff]  ;;  %s197_s13 = scalar_lea.vmem %s1124_s4, %s812_s25 }
   0xe   : > { %891 = vmatprep.subr.mxu1 %v208_v2  ;;  %v1007_v5 = vld [vmem:[%s192_s28 + $0x8] sm:$0xff]  ;;  %v1009_v6 = vld [vmem:[%s192_s28] sm:$0xff]  ;;  %v204_v10 = vld [vmem:[%s1122_s2 + $0x10] sm:$0xff] }
   0xf   : > { %892 = vmatpush3.msra.mxu1 %v208_v2  ;;  %856 = vmatprep.subr.mxu0 %v1007_v5  ;;  %v301_v12 = vld [vmem:[%s1122_s2 + $0x78] sm:$0xff]  ;;  %v300_v13 = vld [vmem:[%s1122_s2 + $0x70] sm:$0xff]  ;;  %v299_v14 = vld [vmem:[%s1122_s2 + $0x68] sm:$0xff] }
  0x10   : > { %893 = vmatprep.subr.mxu1 %v207_v3  ;;  %857 = vmatpush3.msra.mxu0 %v1007_v5  ;;  %v298_v15 = vld [vmem:[%s1122_s2 + $0x60] sm:$0xff]  ;;  %v297_v16 = vld [vmem:[%s1122_s2 + $0x58] sm:$0xff]  ;;  %v203_v17 = vld [vmem:[%s1122_s2 + $0x8] sm:$0xff] }
  0x11   : > { %894 = vmatpush3.msra.mxu1 %v207_v3  ;;  %858 = vmatprep.subr.mxu0 %v1009_v6  ;;  %v296_v18 = vld [vmem:[%s1122_s2 + $0x50] sm:$0xff]  ;;  %v202_v19 = vld [vmem:[%s1122_s2] sm:$0xff]  ;;  %v295_v20 = vld [vmem:[%s1122_s2 + $0x48] sm:$0xff] }
  0x12   : > { %895 = vmatprep.subr.mxu1 %v206_v4  ;;  %859 = vmatpush3.msra.mxu0 %v1009_v6  ;;  %v294_v21 = vld [vmem:[%s1122_s2 + $0x40] sm:$0xff]  ;;  %v555_v22 = vld [vmem:[%s1122_s2 + $0xb8] sm:$0xff]  ;;  %v554_v25 = vld [vmem:[%s1122_s2 + $0xb0] sm:$0xff] }
  0x13   : > { %896 = vmatpush3.msra.mxu1 %v206_v4  ;;  %861 = vmatmul.mubr.msk.f32.vlgmr.msra.gmra.mxu0 %vm210_vm0, %v201_v8  ;;  %v546_v28 = vld [vmem:[%s1121_s1 + $0x20] sm:$0xff]  ;;  %v547_v29 = vld [vmem:[%s1121_s1 + $0x28] sm:$0xff]  ;;  %v551_v32 = vld [vmem:[%s1122_s2 + $0x98] sm:$0xff] }
  0x14   : > { %897 = vmatprep.subr.mxu1 %v205_v7  ;;  %863 = vmatprep.subr.mxu0 %v1007_v5  ;;  %v553_v30 = vld [vmem:[%s1122_s2 + $0xa8] sm:$0xff]  ;;  %v552_v31 = vld [vmem:[%s1122_s2 + $0xa0] sm:$0xff]  ;;  %v550_v33 = vld [vmem:[%s1122_s2 + $0x90] sm:$0xff] }
  0x15   : > { %864 = vmatpush3.msra.mxu0 %v1007_v5  ;;  %867 = vmatprep.mubr.msk.f32.mxu0 %vm210_vm0, %v292_v9  ;;  %v549_v34 = vld [vmem:[%s1122_s2 + $0x88] sm:$0xff]  ;;  %v548_v35 = vld [vmem:[%s1122_s2 + $0x80] sm:$0xff] }
  0x16   : > { %865 = vmatprep.subr.mxu0 %v1009_v6  ;;  %898 = vmatpush3.msra.mxu1 %v205_v7  ;;  %v809_v44 = vld [vmem:[%s1123_s3] ss:$0 sm:$0xff] }
  0x17   : > { %866 = vmatpush3.msra.mxu0 %v1009_v6  ;;  %899 = vmatprep.subr.mxu1 %v204_v10 }
  0x18   : > { %868 = vmatmul.mubr.msk.f32.vlgmr.msra.gmra.mxu0 %vm210_vm0, %v293_v11  ;;  %870 = vmatprep.subr.mxu0 %v301_v12 }
  0x19   : > { %871 = vmatpush3.msra.mxu0 %v301_v12  ;;  %900 = vmatpush3.msra.mxu1 %v204_v10 }
  0x1a   : > { %872 = vmatprep.subr.mxu0 %v300_v13  ;;  %901 = vmatprep.subr.mxu1 %v203_v17 }
  0x1b   : > { %873 = vmatpush3.msra.mxu0 %v300_v13  ;;  %902 = vmatpush3.msra.mxu1 %v203_v17 }
  0x1c   : > { %874 = vmatprep.subr.mxu0 %v299_v14  ;;  %903 = vmatprep.subr.mxu1 %v202_v19 }
  0x1d   : > { %875 = vmatpush3.msra.mxu0 %v299_v14  ;;  %904 = vmatpush3.msra.mxu1 %v202_v19 }
  0x1e   : > { %876 = vmatprep.subr.mxu0 %v298_v15  ;;  %915 = vmatprep.subr.mxu1 %v555_v22 }
  0x1f   : > { %877 = vmatpush3.msra.mxu0 %v298_v15 }
  0x20   : > { %878 = vmatprep.subr.mxu0 %v297_v16 }
  0x21   : > { %879 = vmatpush3.msra.mxu0 %v297_v16 }
  0x22   : > { %880 = vmatprep.subr.mxu0 %v296_v18 }
  0x23   : > { %881 = vmatpush3.msra.mxu0 %v296_v18 }
  0x24   : > { %882 = vmatprep.subr.mxu0 %v295_v20 }
  0x25   : > { %883 = vmatpush3.msra.mxu0 %v295_v20 }
  0x26   : > { %884 = vmatprep.subr.mxu0 %v294_v21 }
  0x27   : > { %885 = vmatpush3.msra.mxu0 %v294_v21 }
  0x28   : > { %908 = vmatprep.subr.mxu0 %v1007_v5 }
  0xd3   : > { %v862_v23 = vpop.f32.mrf.mxu0 }
  0xd5   : > { %v283_v24 = vpop.f32.mrf.mxu0 }
  0xd6   : > { %905 = vmatprep.mubr.msk.f32.mxu1 %vm383_vm1, %v283_v24 }
  0xd7   : > { %906 = vmatmul.mubr.msk.f32.vlgmr.msra.gmra.mxu1 %vm383_vm1, %v862_v23 }
  0xd8   : > { %v869_v26 = vpop.f32.mrf.mxu0  ;;  %916 = vmatpush3.msra.mxu1 %v555_v22 }
  0xd9   : > { %917 = vmatprep.subr.mxu1 %v554_v25 }
  0xda   : > { %v374_v27 = vpop.f32.mrf.mxu0  ;;  %918 = vmatpush3.msra.mxu1 %v554_v25 }
  0xdb   : > { %886 = vmatprep.mubr.msk.f32.mxu0 %vm383_vm1, %v374_v27  ;;  %919 = vmatprep.subr.mxu1 %v553_v30 }
  0xdc   : > { %887 = vmatmul.mubr.msk.f32.vlgmr.msra.gmra.mxu0 %vm383_vm1, %v869_v26  ;;  %920 = vmatpush3.msra.mxu1 %v553_v30 }
  0xdd   : > { %909 = vmatpush3.msra.mxu0 %v1007_v5  ;;  %912 = vmatprep.mubr.msk.f32.mxu0 %vm210_vm0, %v546_v28 }
  0xde   : > { %910 = vmatprep.subr.mxu0 %v1009_v6  ;;  %921 = vmatprep.subr.mxu1 %v552_v31 }
  0xdf   : > { %911 = vmatpush3.msra.mxu0 %v1009_v6  ;;  %922 = vmatpush3.msra.mxu1 %v552_v31 }
  0xe0   : > { %913 = vmatmul.mubr.msk.f32.vlgmr.msra.gmra.mxu0 %vm210_vm0, %v547_v29  ;;  %923 = vmatprep.subr.mxu1 %v551_v32 }
  0xe1   : > { %924 = vmatpush3.msra.mxu1 %v551_v32 }
  0xe2   : > { %925 = vmatprep.subr.mxu1 %v550_v33 }
  0xe3   : > { %926 = vmatpush3.msra.mxu1 %v550_v33 }
  0xe4   : > { %927 = vmatprep.subr.mxu1 %v549_v34 }
  0xe5   : > { %928 = vmatpush3.msra.mxu1 %v549_v34 }
  0xe6   : > { %929 = vmatprep.subr.mxu1 %v548_v35 }
  0xe7   : > { %930 = vmatpush3.msra.mxu1 %v548_v35 }
 0x197   : > { %v907_v40 = vpop.f32.mrf.mxu1 }
 0x199   : > { %v537_v41 = vpop.f32.mrf.mxu1 }
 0x19c   : > { %v888_v36 = vpop.f32.mrf.mxu0 }
 0x19d   : > { %v543_v42 = vadd.f32 %v907_v40, %v888_v36 }
 0x19e   : > { %v456_v37 = vpop.f32.mrf.mxu0 }
 0x19f   : > { %v538_v45 = vadd.f32 %v537_v41, %v456_v37 }
 0x1a0   : > { %v914_v38 = vpop.f32.mrf.mxu0 }
 0x1a2   : > { %v628_v39 = vpop.f32.mrf.mxu0 }
 0x1a3   : > { %931 = vmatprep.mubr.msk.f32.mxu1 %vm383_vm1, %v628_v39 }
 0x1a4   : > { %932 = vmatmul.mubr.msk.f32.vlgmr.msra.gmra.mxu1 %vm383_vm1, %v914_v38 }
 0x264   : > { %v933_v43 = vpop.f32.mrf.mxu1 }
 0x265   : > { %v719_v46 = vadd.f32 %v933_v43, %v543_v42 }
 0x266   : > { %v709_v47 = vpop.f32.mrf.mxu1 }
 0x267   : > { %v728_v48 = vadd.f32 %v809_v44, %v719_v46  ;;  %v718_v49 = vadd.f32 %v709_v47, %v538_v45 }
 0x269   : > { %v730_v50 = vmax.f32 %v728_v48, 0.0  ;;  %v727_v51 = vadd.f32 %v809_v44, %v718_v49 }
 0x26b   : > { %732 = vst [vmem:[%s197_s13 + $0x8] sm:$0xff] %v730_v50  ;;  %v729_v52 = vmax.f32 %v727_v51, 0.0 }
 0x26d   : > { %731 = vst [vmem:[%s197_s13] sm:$0xff] %v729_v52 }
 0x26e PF: > { %s14_s15 = sadd.s32 1, %s948_s15  }
 0x26f   : > { %p11_p4 = scmp.ge.s32.totalorder %s14_s15, 4  }
 0x271   :  { %13 = sbr.rel (!%p11_p4) target bundleno = 1 (0x1), region = 66 }

</bundles_post_ra>
